<compile_context>
chip_gen: v6e
topology: v6e:2x2x1
jax: 0.10.0
libtpu: 0.0.40
codegen_flags: <defaults>
</compile_context>

<pallas_src>
import jax
import jax.numpy as jnp
from jax.experimental import pallas as pl
from jax.experimental.pallas import tpu as pltpu


_HIGHEST = jax.lax.Precision.HIGHEST


def _soft_attention_kernel(x_ref, v_ref, out_ref):
    # x_ref:   (BT, T, D)  inputs block, native dtype
    # v_ref:   (1, 1, D)   folded projection vector W^T @ ctx, float32
    # out_ref: (BT, D)
    bt, _, d = x_ref.shape
    x = x_ref[...]                                               # (BT, T, D)
    vb = jnp.broadcast_to(v_ref[...].astype(x.dtype), (bt, 1, d))

    # Logits: contract D on the MXU (batched (1,D) @ (T,D)^T per row).
    aw = jnp.einsum("bqd,bkd->bqk", vb, x,
                    preferred_element_type=jnp.float32,
                    precision=_HIGHEST)                          # (BT, 1, T)

    # Softmax over T (lane axis); keep the weights unnormalized for pooling.
    m = jnp.max(aw, axis=-1, keepdims=True)                      # (BT, 1, 1)
    e = jnp.exp(aw - m)                                          # (BT, 1, T)
    denom = jnp.sum(e, axis=-1, keepdims=True)                   # (BT, 1, 1)

    # Weighted pooling over T on the MXU with the unnormalized weights.
    pooled = jnp.einsum("bqk,bkd->bqd", e.astype(x.dtype), x,
                        preferred_element_type=jnp.float32,
                        precision=_HIGHEST)                      # (BT, 1, D)

    # Deferred normalization on the small (BT, D) result.  Exact reciprocal:
    # only BT divisor values, so the approx (EUP) path buys nothing here and
    # exactness of the softmax weights is preserved.
    out = pooled * pl.reciprocal(denom, approx=False)            # (BT, 1, D)
    out_ref[...] = out[:, 0, :].astype(out_ref.dtype)


def _vmem_capacity_bytes(default=64 * 1024 * 1024):
    """Physical VMEM of the local TPU; falls back to a v7x-safe 64 MiB."""
    try:
        info = pltpu.get_tpu_info()
    except Exception:  # conservative fallback if the query is unavailable
        return default
    for name in ("vmem_capacity_bytes", "vmem_size_bytes", "vmem_bytes"):
        val = getattr(info, name, None)
        if val:
            try:
                val = int(val)
            except (TypeError, ValueError):
                continue
            if val > 0:
                return val
    return default


def _choose_block_b(B, T, D, itemsize, *, data_budget_bytes,
                    min_steps=4, min_dma_bytes=1 << 20):
    """Pick the batch-tile size BT for the 1-D batch grid.

    VMEM accounting covers the double-buffered (BT, T, D) input block, the
    double-buffered (BT, D) output block and the in-kernel f32 temporaries
    (logits / exp weights / pooled rows).  The tile is sized so that:
      * it fits `data_budget_bytes`;
      * the grid has >= `min_steps` steps when B allows (DMA pipelining and
        >= 2 steps per TensorCore on v7x's two cores);
      * each step's input DMA stays >= `min_dma_bytes` (tiny DMAs cannot reach
        HBM bandwidth) — this wins over the step-count goal;
      * BT is a multiple of 8 when possible (sublane-dense output slab and
        logit tile).
    B need not be divisible by BT: the wrapper uses a pl.cdiv grid and the
    tail block is read padded / stored masked.
    """
    bytes_per_row = T * D * itemsize
    per_row = (2 * bytes_per_row          # double-buffered x block
               + 2 * D * 4                # double-buffered output block
               + 8 * T + 16 * D           # f32 logits/exp + pooled temps
               + 512)                     # slack for lane/sublane padding
    cap = max(1, data_budget_bytes // per_row)

    rows_for_min_steps = -(-B // min_steps)                    # ceil
    rows_for_min_dma = -(-min_dma_bytes // bytes_per_row)      # ceil
    bt = min(cap, max(rows_for_min_steps, rows_for_min_dma), B)
    if bt >= 8:
        bt -= bt % 8                       # sublane-dense (BT, D) / (BT, T)
    return max(1, bt)


def soft_attention(inputs, weight, bias, context, *, block_b=None):
    """inputs: (B, T, D); weight: (A, D); bias: (A,); context: (A, 1) -> (B, D)."""
    # b @ ctx adds the same constant to every logit of a row; softmax is
    # shift-invariant so the bias cancels exactly and is dropped.
    del bias
    B, T, D = inputs.shape

    # Fold the dense layer with the context vector once, in f32:
    # v = W^T @ ctx, shape (D,).  The attention dim A never enters the kernel.
    v = jnp.matmul(weight.astype(jnp.float32).T, context.astype(jnp.float32),
                   precision=_HIGHEST).reshape(1, 1, D)

    # Generation-aware VMEM budget (v5e/v6e: 128 MiB physical, v7x: 64 MiB).
    vmem_limit = min(int(_vmem_capacity_bytes()) * 3 // 4, 96 * 1024 * 1024)
    bt = block_b if block_b is not None else _choose_block_b(
        B, T, D, inputs.dtype.itemsize, data_budget_bytes=vmem_limit // 2)
    bt = min(bt, B)

    # NOTE: if D is not a multiple of 128 (or T of 8) the implicit lane /
    # sublane padding is accepted knowingly — pre-padding x in the wrapper
    # would cost an extra HBM round-trip of the whole input.
    # TODO(synk): for very large T (a single x row no longer fits VMEM) add a
    # T grid axis ("arbitrary", last) with an online-softmax (m, l, acc)
    # scratch accumulator; unnecessary at these shapes.
    return pl.pallas_call(
        _soft_attention_kernel,
        out_shape=jax.ShapeDtypeStruct((B, D), inputs.dtype),
        grid_spec=pltpu.PrefetchScalarGridSpec(
            num_scalar_prefetch=0,
            grid=(pl.cdiv(B, bt),),
            in_specs=[
                pl.BlockSpec((bt, T, D), lambda b: (b, 0, 0)),   # x tile
                pl.BlockSpec((1, 1, D), lambda b: (0, 0, 0)),    # folded v
            ],
            out_specs=pl.BlockSpec((bt, D), lambda b: (b, 0)),
        ),
        compiler_params=pltpu.CompilerParams(
            dimension_semantics=("parallel",),
            vmem_limit_bytes=vmem_limit,
        ),
    )(inputs, v)


def init_params(key, input_dim, attention_dim):
    """Deterministic init matching the PyTorch module's parameter shapes."""
    k_ctx, k_w, k_b = jax.random.split(key, 3)
    # context: xavier_uniform on (attention_dim, 1)
    ctx_bound = (6.0 / (attention_dim + 1)) ** 0.5
    context = jax.random.uniform(
        k_ctx, (attention_dim, 1), jnp.float32, -ctx_bound, ctx_bound)
    # nn.Linear default init: U(-1/sqrt(in), 1/sqrt(in))
    lin_bound = 1.0 / (input_dim ** 0.5)
    weight = jax.random.uniform(
        k_w, (attention_dim, input_dim), jnp.float32, -lin_bound, lin_bound)
    bias = jax.random.uniform(
        k_b, (attention_dim,), jnp.float32, -lin_bound, lin_bound)
    return weight, bias, context


def soft_attention_ref(inputs, weight, bias, context):
    """Plain-JAX reference mirroring the PyTorch forward (un-folded)."""
    t = jnp.einsum("btd,ad->bta", inputs, weight, precision=_HIGHEST) + bias
    aw = jnp.squeeze(
        jnp.einsum("bta,ao->bto", t, context, precision=_HIGHEST), -1)  # (B, T)
    score = jax.nn.softmax(aw, axis=-1)                                  # (B, T)
    return jnp.sum(inputs * score[..., None], axis=-2)                   # (B, D)


if __name__ == "__main__":
    B, T, D, A = 2, 8, 32, 16  # batch, seq, input_dim, attention_dim

    key = jax.random.PRNGKey(0)
    k_x, k_p = jax.random.split(key)
    x = jax.random.normal(k_x, (B, T, D), jnp.float32)
    weight, bias, context = init_params(k_p, D, A)

    out = soft_attention(x, weight, bias, context)
    out = jax.block_until_ready(out)

    ref = soft_attention_ref(x, weight, bias, context)
    assert out.shape == (B, D)
    # Tolerance covers the reassociated (folded) projection matmul.
    err = jnp.max(jnp.abs(out - ref))
    assert jnp.allclose(out, ref, atol=1e-3, rtol=1e-3), f"max abs err {err}"

    print("KERNEL_OK")
</pallas_src>

<mosaic_0001>
module attributes {stable_mosaic.version = 11 : i64} {
  func.func @_soft_attention_kernel(%arg0: i32, %arg1: memref<2x8x32xf32, #tpu.memory_space<vmem>>, %arg2: memref<1x1x32xf32, #tpu.memory_space<vmem>>, %arg3: memref<2x32xf32, #tpu.memory_space<vmem>>) attributes {dimension_semantics = [#tpu.dimension_semantics<parallel>], iteration_bounds = array<i64: 1>, scalar_prefetch = 0 : i64, scratch_operands = 0 : i64, tpu.core_type = #tpu.core_type<tc>, window_params = [{transform_indices = @transform_0, window_bounds = array<i64: 2, 8, 32>}, {pipeline_mode = #tpu.pipeline_mode<synchronous>, transform_indices = @transform_1, window_bounds = array<i64: 1, 1, 32>}, {transform_indices = @transform_2, window_bounds = array<i64: 2, 32>}]} {
    %c0 = arith.constant 0 : index
    %c0_0 = arith.constant 0 : index
    %c0_1 = arith.constant 0 : index
    %0 = vector.load %arg1[%c0, %c0_0, %c0_1] : memref<2x8x32xf32, #tpu.memory_space<vmem>>, vector<2x8x32xf32>
    %c0_2 = arith.constant 0 : index
    %c0_3 = arith.constant 0 : index
    %c0_4 = arith.constant 0 : index
    %1 = vector.load %arg2[%c0_2, %c0_3, %c0_4] : memref<1x1x32xf32, #tpu.memory_space<vmem>>, vector<1x1x32xf32>
    %2 = vector.shape_cast %1 : vector<1x1x32xf32> to vector<1x1x32xf32>
    %3 = vector.broadcast %2 : vector<1x1x32xf32> to vector<2x1x32xf32>
    "tpu.trace_start"() <{level = 10 : i32, message = "bqd,bkd->bqk"}> : () -> ()
    %cst = arith.constant dense<0.000000e+00> : vector<2x1x8xf32>
    %4 = tpu.matmul %3, %0, %cst {dimension_numbers = #tpu.dot_dimension_numbers<[2], [2], [1], [1], [0, 0, 0, 1, 1, 1], [0], [0]>, precision = #tpu.contract_precision<fp32>} : vector<2x1x32xf32>, vector<2x8x32xf32>, vector<2x1x8xf32> -> vector<2x1x8xf32>
    "tpu.trace_stop"() : () -> ()
    %cst_5 = arith.constant dense<0xFF800000> : vector<2x1xf32>
    %5 = vector.multi_reduction <maximumf>, %4, %cst_5 [2] : vector<2x1x8xf32> to vector<2x1xf32>
    %6 = vector.shape_cast %5 : vector<2x1xf32> to vector<2x1x1xf32>
    %7 = vector.broadcast %6 : vector<2x1x1xf32> to vector<2x1x8xf32>
    %8 = arith.subf %4, %7 : vector<2x1x8xf32>
    %9 = math.exp %8 : vector<2x1x8xf32>
    %cst_6 = arith.constant dense<0.000000e+00> : vector<2x1xf32>
    %10 = vector.multi_reduction <add>, %9, %cst_6 [2] : vector<2x1x8xf32> to vector<2x1xf32>
    %11 = vector.shape_cast %10 : vector<2x1xf32> to vector<2x1x1xf32>
    "tpu.trace_start"() <{level = 10 : i32, message = "bqk,bkd->bqd"}> : () -> ()
    %cst_7 = arith.constant dense<0.000000e+00> : vector<2x1x32xf32>
    %12 = tpu.matmul %9, %0, %cst_7 {dimension_numbers = #tpu.dot_dimension_numbers<[2], [1], [1], [2], [0, 0, 0, 1, 1, 2], [0], [0]>, precision = #tpu.contract_precision<fp32>} : vector<2x1x8xf32>, vector<2x8x32xf32>, vector<2x1x32xf32> -> vector<2x1x32xf32>
    "tpu.trace_stop"() : () -> ()
    %13 = tpu.reciprocal %11 : vector<2x1x1xf32> -> vector<2x1x1xf32>
    %14 = vector.broadcast %13 : vector<2x1x1xf32> to vector<2x1x32xf32>
    %15 = arith.mulf %12, %14 : vector<2x1x32xf32>
    %16 = vector.shape_cast %15 : vector<2x1x32xf32> to vector<2x32xf32>
    %c0_8 = arith.constant 0 : index
    %c0_9 = arith.constant 0 : index
    %17 = vector.load %arg3[%c0_8, %c0_9] : memref<2x32xf32, #tpu.memory_space<vmem>>, vector<2x32xf32>
    tpu.vector_store %arg3[%c0_8, %c0_9], %16 {strides = array<i32>} : memref<2x32xf32, #tpu.memory_space<vmem>>, vector<2x32xf32>,
    return
  }
  func.func @transform_0(%arg0: i32) -> (i32, i32, i32) {
    %c0_i32 = arith.constant 0 : i32
    %c0_i32_0 = arith.constant 0 : i32
    %c0_i32_1 = arith.constant 0 : i32
    return %arg0, %c0_i32, %c0_i32_0 : i32, i32, i32
  }
  func.func @transform_1(%arg0: i32) -> (i32, i32, i32) {
    %c0_i32 = arith.constant 0 : i32
    %c0_i32_0 = arith.constant 0 : i32
    %c0_i32_1 = arith.constant 0 : i32
    %c0_i32_2 = arith.constant 0 : i32
    return %c0_i32, %c0_i32_0, %c0_i32_1 : i32, i32, i32
  }
  func.func @transform_2(%arg0: i32) -> (i32, i32) {
    %c0_i32 = arith.constant 0 : i32
    %c0_i32_0 = arith.constant 0 : i32
    return %arg0, %c0_i32 : i32, i32
  }
}

</mosaic_0001>

<bundles_post_ra>
// kernel: tpu_custom_call.1
= control target key start
LH: loop header
LB: loop body
LE: loop exit
PB: predicated region body
PF: predicated region fallthrough
CT: control target
= control target key end

     0   :  { %7 = vsyncpa [#allocation3], 0  ;;  %s2226_s0 = inlined_call_operand.hbm [shape: f32[2,8,32], index: 0, kind: input, shape index: {}]   ;;  %s2227_s1 = inlined_call_operand.vmem [shape: f32[1,1,32], index: 1, kind: input, shape index: {}]   ;;  %s2228_s2 = inlined_call_operand.hbm [shape: f32[2,32], index: 2, kind: output, shape index: {}]  }
   0x1   :  { %8 = vsyncpa [#allocation4], 0  ;;  %s2102_s9 = smov [#allocation2]  }
   0x2   :  { %s14_s10 = sshll.u32 %s2102_s9, 4  ;;  %s15_s10 = int_to_ptr.vmem [resolvable:$true] %s14_s10 }
   0x3   :  { %s2066_s11 = scalar_lea.vmem %s15_s10, 256  ;;  %p2071_p1 = scmp.lt.s32.totalorder %s15_s10, %s15_s10 }
   0x4   :  { %p2067_p0 = scmp.ne.s32.totalorder %s15_s10, %s2066_s11  ;;  %p2072_p2 = scmp.lt.s32.totalorder %s2066_s11, %s2066_s11 }
   0x6   :  { %p2073_p3 = por %p2072_p2, %p2071_p1 }
   0x8   :  { %p2074_p4 = pnand %p2073_p3, %p2067_p0 }
   0xa   :  { %2077 = shalt.err (!%p2074_p4)
}
   0xb   :  { %s2103_s12 = smov 128   ;;  %s2104_s13 = smov 8  }
   0xc   :  { %20 = dma.hbm_to_vmem [thread:$0]  %s2226_s0, 256, %s15_s10, [#allocation3], %s2103_s12, %s2103_s12, %s2104_s13  }
   0xd   :  { %2098 = dma.done.wait [#allocation3], 256  }
   0xe   :  { %2099 = vsyncadd [#allocation3], 4294967040  ;;  %v2105_v0 = vmov 0.0   ;;  %vm2106_vm0 = vmmov 0   ;;  %vm29_vm1 = vcmask 261120   ;;  %v2132_v1 = vld [vmem:[#allocation2] sm:$0xff] }
   0xf   :  { %1924 = vmatprep.subr.mxu0 %v2105_v0  ;;  %1926 = vmatprep.mubr.msk.f32.mxu0 %vm2106_vm0, %v2105_v0  ;;  %v28_v2 = vld [vmem:[%s2227_s1] sm:$0x1]  ;;  %v2137_v3 = vld [vmem:[#allocation2 + $0x8] sm:$0xff]  ;;  %v34_v5 = vsel %vm29_vm1, %v2132_v1, 0  ;;  %v2171_v22 = vand.u32 4294901760, %v2132_v1  ;;  %vm931_vm2 = vcmask 57344  }
  0x10   :  { %1929 = vmatprep.subr.mxu1 %v2105_v0  ;;  %1931 = vmatprep.mubr.msk.f32.mxu1 %vm2106_vm0, %v2105_v0  ;;  %v31_v4 = vsel %vm29_vm1, %v28_v2, 0  ;;  %v483_v6 = vsel %vm29_vm1, %v2137_v3, 0  ;;  %v67_v7 = vand.u32 4294901760, %v34_v5  ;;  %vm950_vm3 = vcmask 64512   ;;  %s2107_s0 = smov [#allocation5]  }
  0x11   :  { %v102_v8 = vand.u32 4294901760, %v31_v4  ;;  %v516_v11 = vand.u32 4294901760, %v483_v6  ;;  %v1062_v59 = vsub.f32 %v2132_v1, %v2171_v22  ;;  %s1867_s1 = sshll.u32 %s2107_s0, 4  ;;  %vm1856_vm4 = vcmask 1041409   ;;  %s1868_s1 = int_to_ptr.vmem [resolvable:$true] %s1867_s1 }
  0x12   :  { %1925 = vmatpush3.xpose.msra.mxu0 %v67_v7  ;;  %v144_v10 = vsub.f32 %v34_v5, %v67_v7  ;;  %v1434_v5 = vand.u32 4294901760, %v2137_v3  ;;  %vm1859_vm5 = vcmask 254976   ;;  %s2078_s18 = scalar_lea.vmem %s1868_s1, 32  ;;  %p2083_p6 = scmp.lt.s32.totalorder %s1868_s1, %s1868_s1 }
  0x13   :  { %v103_v9 = vsub.f32 %v31_v4, %v102_v8  ;;  %1934 = vmatprep.subr.mxu0 %v2105_v0  ;;  %v593_v16 = vsub.f32 %v483_v6, %v516_v11  ;;  %v1063_v60 = vand.u32 4294901760, %v1062_v59  ;;  %p2079_p5 = scmp.ne.s32.totalorder %s1868_s1, %s2078_s18  ;;  %p2084_p7 = scmp.lt.s32.totalorder %s2078_s18, %s2078_s18 }
  0x14   :  { %v145_v13 = vand.u32 4294901760, %v144_v10 }
  0x15   :  { %v104_v12 = vand.u32 4294901760, %v103_v9  ;;  %v594_v19 = vand.u32 4294901760, %v593_v16  ;;  %v1064_v61 = vsub.f32 %v1062_v59, %v1063_v60  ;;  %p2085_p8 = por %p2084_p7, %p2083_p6 }
  0x16   :  { %v146_v15 = vsub.f32 %v144_v10, %v145_v13 }
  0x17   :  { %v105_v14 = vsub.f32 %v103_v9, %v104_v12  ;;  %v595_v20 = vsub.f32 %v593_v16, %v594_v19  ;;  %v1065_v62 = vand.u32 4294901760, %v1064_v61  ;;  %p2086_p9 = pnand %p2085_p8, %p2079_p5 }
  0x18   :  { %v147_v18 = vand.u32 4294901760, %v146_v15 }
  0x19   :  { %v106_v17 = vand.u32 4294901760, %v105_v14  ;;  %v596_v21 = vand.u32 4294901760, %v595_v20 }
  0x1a   :  { %1930 = vmatpush3.xpose.msra.mxu1 %v147_v18 }
  0x1b   :  { %1927 = vmatmul.mubr.f32.vlgmr.msra.gmra.mxu0 %v106_v17  ;;  %1939 = vmatprep.subr.mxu1 %v2105_v0 }
  0x1c   :  { %1935 = vmatpush3.xpose.msra.mxu0 %v144_v10  ;;  %1936 = vmatprep.mubr.msk.f32.mxu0 %vm2106_vm0, %v2105_v0 }
  0x1d   :  { %1944 = vmatprep.subr.mxu0 %v2105_v0  ;;  %1932 = vmatmul.mubr.f32.vlgmr.msra.gmra.mxu1 %v102_v8 }
  0x1e   :  { %1940 = vmatpush3.xpose.msra.mxu1 %v67_v7  ;;  %1941 = vmatprep.mubr.msk.f32.mxu1 %vm2106_vm0, %v2105_v0 }
  0x1f   :  { %1937 = vmatmul.mubr.f32.vlgmr.msra.gmra.mxu0 %v103_v9  ;;  %1949 = vmatprep.subr.mxu1 %v2105_v0 }
  0x20   :  { %1945 = vmatpush3.xpose.msra.mxu0 %v145_v13  ;;  %1946 = vmatprep.mubr.msk.f32.mxu0 %vm2106_vm0, %v2105_v0 }
  0x21   :  { %1942 = vmatmul.mubr.f32.vlgmr.msra.gmra.mxu1 %v104_v12  ;;  %1954 = vmatprep.subr.mxu0 %v2105_v0 }
  0x22   :  { %1950 = vmatpush3.xpose.msra.mxu1 %v67_v7  ;;  %1951 = vmatprep.mubr.msk.f32.mxu1 %vm2106_vm0, %v2105_v0 }
  0x23   :  { %1947 = vmatmul.mubr.f32.vlgmr.msra.gmra.mxu0 %v102_v8  ;;  %1959 = vmatprep.subr.mxu1 %v2105_v0 }
  0x24   :  { %1955 = vmatpush3.xpose.msra.mxu0 %v516_v11  ;;  %1956 = vmatprep.mubr.msk.f32.mxu0 %vm2106_vm0, %v2105_v0 }
  0x25   :  { %1952 = vmatmul.mubr.f32.vlgmr.msra.gmra.mxu1 %v102_v8  ;;  %1964 = vmatprep.subr.mxu0 %v2105_v0 }
  0x26   :  { %1960 = vmatpush3.xpose.msra.mxu1 %v596_v21  ;;  %1961 = vmatprep.mubr.msk.f32.mxu1 %vm2106_vm0, %v2105_v0 }
  0x27   :  { %1957 = vmatmul.mubr.f32.vlgmr.msra.gmra.mxu0 %v106_v17  ;;  %1969 = vmatprep.subr.mxu1 %v2105_v0 }
  0x28   :  { %1965 = vmatpush3.xpose.msra.mxu0 %v593_v16  ;;  %1966 = vmatprep.mubr.msk.f32.mxu0 %vm2106_vm0, %v2105_v0 }
  0x29   :  { %1962 = vmatmul.mubr.f32.vlgmr.msra.gmra.mxu1 %v102_v8  ;;  %1974 = vmatprep.subr.mxu0 %v2105_v0 }
  0x2a   :  { %1970 = vmatpush3.xpose.msra.mxu1 %v516_v11  ;;  %1971 = vmatprep.mubr.msk.f32.mxu1 %vm2106_vm0, %v2105_v0 }
  0x2b   :  { %1967 = vmatmul.mubr.f32.vlgmr.msra.gmra.mxu0 %v103_v9  ;;  %1979 = vmatprep.subr.mxu1 %v2105_v0  ;;  %v1511_v9 = vsub.f32 %v2137_v3, %v1434_v5 }
  0x2c   :  { %1975 = vmatpush3.xpose.msra.mxu0 %v594_v19  ;;  %1976 = vmatprep.mubr.msk.f32.mxu0 %vm2106_vm0, %v2105_v0 }
  0x2d   :  { %1972 = vmatmul.mubr.f32.vlgmr.msra.gmra.mxu1 %v104_v12  ;;  %1984 = vmatprep.subr.mxu0 %v2105_v0  ;;  %v1512_v12 = vand.u32 4294901760, %v1511_v9 }
  0x2e   :  { %1980 = vmatpush3.xpose.msra.mxu1 %v516_v11  ;;  %1981 = vmatprep.mubr.msk.f32.mxu1 %vm2106_vm0, %v2105_v0 }
  0x2f   :  { %1977 = vmatmul.mubr.f32.vlgmr.msra.gmra.mxu0 %v102_v8  ;;  %1989 = vmatprep.subr.mxu1 %v2105_v0  ;;  %v1513_v15 = vsub.f32 %v1511_v9, %v1512_v12 }
  0x30   :  { %1985 = vmatpush3.msra.mxu0 %v2171_v22  ;;  %1986 = vmatprep.mubr.msk.f32.mxu0 %vm2106_vm0, %v2105_v0 }
  0x31   :  { %1982 = vmatmul.mubr.f32.vlgmr.msra.gmra.mxu1 %v102_v8  ;;  %1994 = vmatprep.subr.mxu0 %v2105_v0  ;;  %v1514_v17 = vand.u32 4294901760, %v1513_v15 }
  0x32   :  { %1991 = vmatprep.mubr.msk.f32.mxu1 %vm2106_vm0, %v2105_v0  ;;  %1990 = vmatpush3.msra.mxu1 %v1065_v62 }
  0x33   :  { %1999 = vmatprep.subr.mxu1 %v2105_v0 }
  0xdb   :  { %v108_v23 = vpop.f32.mrf.mxu0 }
  0xdd   :  { %v1928_v24 = vpop.f32.mrf.mxu0  ;;  %v184_v25 = vpop.f32.mrf.mxu1 }
  0xde   :  { %v185_v26 = vadd.f32 %v184_v25, %v108_v23 }
  0xdf   :  { %v258_v27 = vpop.f32.mrf.mxu0  ;;  %v1933_v28 = vpop.f32.mrf.mxu1 }
  0xe0   :  { %v259_v29 = vadd.f32 %v258_v27, %v185_v26 }
  0xe1   :  { %v1938_v30 = vpop.f32.mrf.mxu0  ;;  %v332_v31 = vpop.f32.mrf.mxu1 }
  0xe2   :  { %v333_v32 = vadd.f32 %v332_v31, %v259_v29 }
  0xe3   :  { %v406_v33 = vpop.f32.mrf.mxu0  ;;  %v1943_v34 = vpop.f32.mrf.mxu1 }
  0xe4   :  { %v407_v35 = vadd.f32 %v406_v33, %v333_v32 }
  0xe5   :  { %v1948_v36 = vpop.f32.mrf.mxu0  ;;  %v478_v37 = vpop.f32.mrf.mxu1 }
  0xe6   :  { %v479_v38 = vadd.f32 %v478_v37, %v407_v35 }
  0xe7   :  { %v557_v39 = vpop.f32.mrf.mxu0  ;;  %v1953_v40 = vpop.f32.mrf.mxu1 }
  0xe8   :  { %v932_v42 = vsel %vm931_vm2, %v479_v38, -inf }
  0xe9   :  { %v1958_v41 = vpop.f32.mrf.mxu0  ;;  %v633_v43 = vpop.f32.mrf.mxu1  ;;  %933 = vmax.xlane.f32.xlu0 %v932_v42 }
  0xea   :  { %v634_v44 = vadd.f32 %v633_v43, %v557_v39 }
  0xeb   :  { %v707_v45 = vpop.f32.mrf.mxu0  ;;  %v1963_v46 = vpop.f32.mrf.mxu1 }
  0xec   :  { %v708_v47 = vadd.f32 %v707_v45, %v634_v44 }
  0xed   :  { %v1968_v48 = vpop.f32.mrf.mxu0  ;;  %v781_v49 = vpop.f32.mrf.mxu1 }
  0xee   :  { %v782_v50 = vadd.f32 %v781_v49, %v708_v47 }
  0xef   :  { %v855_v51 = vpop.f32.mrf.mxu0  ;;  %v1973_v52 = vpop.f32.mrf.mxu1 }
  0xf0   :  { %v856_v53 = vadd.f32 %v855_v51, %v782_v50 }
  0xf1   :  { %v1978_v54 = vpop.f32.mrf.mxu0  ;;  %v927_v55 = vpop.f32.mrf.mxu1 }
  0xf2   :  { %v928_v56 = vadd.f32 %v927_v55, %v856_v53 }
  0xf3   :  { %v1983_v57 = vpop.f32.mrf.mxu1 }
  0xf4   :  { %v935_v58 = vsel %vm931_vm2, %v928_v56, -inf }
  0xf5   :  { %936 = vmax.xlane.f32.xlu0 %v935_v58 }
 0x172   :  { %v934_v63 = vpop.xlane.xlu0 %933 }
 0x173   :  { %v938_v2 = vsub.f32 %v479_v38, %v934_v63 }
 0x175   :  { %v940_v4 = vmul.f32 1.442695, %v938_v2 }
 0x177   :  { %2050 = vpow2.f32 %v940_v4 }
 0x17e   :  { %v937_v6 = vpop.xlane.xlu0 %936 }
 0x17f   :  { %v939_v7 = vsub.f32 %v928_v56, %v937_v6 }
 0x181   :  { %v942_v8 = vmul.f32 1.442695, %v939_v7 }
 0x183   :  { %2052 = vpow2.f32 %v942_v8 }
 0x184   :  { %v2051_v1 = vpop.eup %2050 }
 0x185   :  { %v952_v10 = vsel %vm950_vm3, %v2051_v1, 0  ;;  %v944_v23 = vsel %vm931_vm2, %v2051_v1, 0.0 }
 0x186   :  { %v1020_v11 = vand.u32 4294901760, %v952_v10 }
 0x188   :  { %v1021_v13 = vsub.f32 %v952_v10, %v1020_v11  ;;  %1992 = vmatmul.mubr.f32.vlgmr.msra.gmra.mxu1 %v1020_v11 }
 0x189   :  { %2000 = vmatpush3.msra.mxu1 %v2171_v22  ;;  %2001 = vmatprep.mubr.msk.f32.mxu1 %vm2106_vm0, %v2105_v0 }
 0x18a   :  { %v1022_v14 = vand.u32 4294901760, %v1021_v13  ;;  %2009 = vmatprep.subr.mxu1 %v2105_v0 }
 0x18c   :  { %2002 = vmatmul.mubr.f32.vlgmr.msra.gmra.mxu1 %v1022_v14  ;;  %v1023_v16 = vsub.f32 %v1021_v13, %v1022_v14 }
 0x18d   :  { %2010 = vmatpush3.msra.mxu1 %v2171_v22  ;;  %2011 = vmatprep.mubr.msk.f32.mxu1 %vm2106_vm0, %v2105_v0 }
 0x18e   :  { %v1024_v3 = vand.u32 4294901760, %v1023_v16  ;;  %2019 = vmatprep.subr.mxu1 %v2105_v0 }
 0x190   :  { %v2053_v18 = vpop.eup %2052  ;;  %1987 = vmatmul.mubr.f32.vlgmr.msra.gmra.mxu0 %v1024_v3  ;;  %2012 = vmatmul.mubr.f32.vlgmr.msra.gmra.mxu1 %v1020_v11 }
 0x191   :  { %1995 = vmatpush3.msra.mxu0 %v1062_v59  ;;  %v947_v19 = vsel %vm931_vm2, %v2053_v18, 0.0  ;;  %1996 = vmatprep.mubr.msk.f32.mxu0 %vm2106_vm0, %v2105_v0  ;;  %v1401_v20 = vsel %vm950_vm3, %v2053_v18, 0 }
 0x192   :  { %948 = vadd.xlane.f32.xlu1 %v947_v19  ;;  %2020 = vmatpush3.msra.mxu1 %v1514_v17  ;;  %v1469_v21 = vand.u32 4294901760, %v1401_v20 }
 0x193   :  { %2021 = vmatprep.mubr.msk.f32.mxu1 %vm2106_vm0, %v2105_v0  ;;  %2004 = vmatprep.subr.mxu0 %v2105_v0 }
 0x194   :  { %1997 = vmatmul.mubr.f32.vlgmr.msra.gmra.mxu0 %v1021_v13  ;;  %v1470_v22 = vsub.f32 %v1401_v20, %v1469_v21  ;;  %2022 = vmatmul.mubr.f32.vlgmr.msra.gmra.mxu1 %v1469_v21 }
 0x195   :  { %2005 = vmatpush3.msra.mxu0 %v1063_v60  ;;  %2029 = vmatprep.subr.mxu1 %v2105_v0 }
 0x196   :  { %945 = vadd.xlane.f32.xlu1 %v944_v23  ;;  %2006 = vmatprep.mubr.msk.f32.mxu0 %vm2106_vm0, %v2105_v0  ;;  %v1471_v24 = vand.u32 4294901760, %v1470_v22 }
 0x197   :  { %2030 = vmatpush3.msra.mxu1 %v1434_v5  ;;  %2031 = vmatprep.mubr.msk.f32.mxu1 %vm2106_vm0, %v2105_v0 }
 0x198   :  { %2007 = vmatmul.mubr.f32.vlgmr.msra.gmra.mxu0 %v1020_v11  ;;  %2014 = vmatprep.subr.mxu0 %v2105_v0  ;;  %v1472_v25 = vsub.f32 %v1470_v22, %v1471_v24 }
 0x199   :  { %2032 = vmatmul.mubr.f32.vlgmr.msra.gmra.mxu1 %v1471_v24  ;;  %2015 = vmatpush3.msra.mxu0 %v1434_v5 }
 0x19a   :  { %2039 = vmatprep.subr.mxu1 %v2105_v0  ;;  %2016 = vmatprep.mubr.msk.f32.mxu0 %vm2106_vm0, %v2105_v0  ;;  %v1473_v26 = vand.u32 4294901760, %v1472_v25 }
 0x19b   :  { %2040 = vmatpush3.msra.mxu1 %v1434_v5  ;;  %2041 = vmatprep.mubr.msk.f32.mxu1 %vm2106_vm0, %v2105_v0 }
 0x19c   :  { %2017 = vmatmul.mubr.f32.vlgmr.msra.gmra.mxu0 %v1473_v26  ;;  %2024 = vmatprep.subr.mxu0 %v2105_v0 }
 0x19d   :  { %2042 = vmatmul.mubr.f32.vlgmr.msra.gmra.mxu1 %v1469_v21  ;;  %2025 = vmatpush3.msra.mxu0 %v1511_v9 }
 0x19e   :  { %2026 = vmatprep.mubr.msk.f32.mxu0 %vm2106_vm0, %v2105_v0  ;;  %2034 = vmatprep.subr.mxu0 %v2105_v0 }
 0x1a0   :  { %2027 = vmatmul.mubr.f32.vlgmr.msra.gmra.mxu0 %v1470_v22 }
 0x1a1   :  { %2035 = vmatpush3.msra.mxu0 %v1512_v12  ;;  %2036 = vmatprep.mubr.msk.f32.mxu0 %vm2106_vm0, %v2105_v0 }
 0x1a4   :  { %2037 = vmatmul.mubr.f32.vlgmr.msra.gmra.mxu0 %v1469_v21 }
 0x21b   :  { %v949_v35 = vpop.xlane.xlu1 %948 }
 0x21c   :  { %2054 = vrcp.f32 %v949_v35 }
 0x21f   :  { %v946_v43 = vpop.xlane.xlu1 %945 }
 0x220   :  { %2056 = vrcp.f32 %v946_v43 }
 0x229   :  { %v2055_v62 = vpop.eup %2054 }
 0x22d   :  { %v2057_v2 = vpop.eup %2056 }
 0x248   :  { %v1102_v27 = vpop.f32.mrf.mxu1 }
 0x24a   :  { %v1993_v28 = vpop.f32.mrf.mxu1 }
 0x24c   :  { %v1250_v29 = vpop.f32.mrf.mxu1 }
 0x24e   :  { %v2003_v30 = vpop.f32.mrf.mxu1 }
 0x250   :  { %v1026_v31 = vpop.f32.mrf.mxu0  ;;  %v1396_v32 = vpop.f32.mrf.mxu1 }
 0x251   :  { %v1103_v41 = vadd.f32 %v1102_v27, %v1026_v31 }
 0x252   :  { %v1988_v33 = vpop.f32.mrf.mxu0  ;;  %v2013_v34 = vpop.f32.mrf.mxu1 }
 0x254   :  { %v1176_v36 = vpop.f32.mrf.mxu0  ;;  %v1551_v37 = vpop.f32.mrf.mxu1 }
 0x255   :  { %v1177_v0 = vadd.f32 %v1176_v36, %v1103_v41 }
 0x256   :  { %v1998_v38 = vpop.f32.mrf.mxu0  ;;  %v2023_v39 = vpop.f32.mrf.mxu1 }
 0x257   :  { %v1251_v49 = vadd.f32 %v1250_v29, %v1177_v0 }
 0x258   :  { %v1324_v40 = vpop.f32.mrf.mxu0 }
 0x259   :  { %v1699_v42 = vpop.f32.mrf.mxu1  ;;  %v1325_v55 = vadd.f32 %v1324_v40, %v1251_v49 }
 0x25a   :  { %v2008_v44 = vpop.f32.mrf.mxu0 }
 0x25b   :  { %v2033_v45 = vpop.f32.mrf.mxu1  ;;  %v1397_v60 = vadd.f32 %v1396_v32, %v1325_v55 }
 0x25c   :  { %v1475_v46 = vpop.f32.mrf.mxu0 }
 0x25d   :  { %v1845_v47 = vpop.f32.mrf.mxu1  ;;  %v1552_v50 = vadd.f32 %v1551_v37, %v1475_v46  ;;  %v1851_v4 = vmul.f32 %v2057_v2, %v1397_v60 }
 0x25e   :  { %v2018_v48 = vpop.f32.mrf.mxu0 }
 0x25f   :  { %v2043_v51 = vpop.f32.mrf.mxu1 }
 0x260   :  { %v1625_v52 = vpop.f32.mrf.mxu0 }
 0x261   :  { %v1626_v53 = vadd.f32 %v1625_v52, %v1552_v50 }
 0x262   :  { %v2028_v54 = vpop.f32.mrf.mxu0 }
 0x263   :  { %v1700_v56 = vadd.f32 %v1699_v42, %v1626_v53 }
 0x264   :  { %v1773_v57 = vpop.f32.mrf.mxu0 }
 0x265   :  { %v1774_v58 = vadd.f32 %v1773_v57, %v1700_v56 }
 0x266   :  { %v2038_v59 = vpop.f32.mrf.mxu0 }
 0x267   :  { %v1846_v61 = vadd.f32 %v1845_v47, %v1774_v58 }
 0x269   :  { %v1852_v63 = vmul.f32 %v2055_v62, %v1846_v61 }
 0x26b   :  { %v1855_v5 = vrot.slane %v1852_v63, 7 }
 0x26d   :  { %v1857_v6 = vsel %vm1856_vm4, %v1855_v5, %v1851_v4 }
 0x26e   :  { %1860 = vst.msk [vmem:[#allocation5] sm:$0x3] %vm1859_vm5, %v1857_v6 }
 0x26f   :  { %2089 = shalt.err (!%p2086_p9)
}
 0x270   :  { %1870 = dma.vmem_to_hbm [thread:$0]  %s1868_s1, 32, %s2228_s2, [#allocation4]  }
 0x271   :  { %2100 = dma.done.wait [#allocation4], 32  }
 0x272   :  { %2101 = vsyncadd [#allocation4], 4294967264 }
 0x273   :  { %1874 = vsyncpa [#allocation3], 1 }
 0x274   :  { %1875 = vsyncpa [#allocation4], 1 }

</bundles_post_ra>
